<compile_context>
chip_gen: v6e
topology: v6e:2x2x1
jax: 0.10.0
libtpu: 0.0.40
codegen_flags: <defaults>
</compile_context>

<pallas_src>
import functools

import jax
import jax.numpy as jnp
from jax.experimental import pallas as pl
from jax.experimental.pallas import tpu as pltpu


# ---------------------------------------------------------------------------
# Hardware-aware sizing
# ---------------------------------------------------------------------------

def _largest_divisor_leq(n, limit):
    """Largest divisor of n that is <= limit."""
    limit = max(1, min(n, limit))
    for d in range(limit, 0, -1):
        if n % d == 0:
            return d
    return 1


def _tpu_config():
    """Generation-aware VMEM / tiling budgets.

    v5e/v6e: 128 MiB VMEM, 1 TensorCore.  v7x: 64 MiB VMEM, 2 TensorCores.
    """
    kind = ""
    try:
        kind = jax.devices()[0].device_kind.lower()
    except Exception:
        pass
    vmem_capacity = 0
    try:
        info = pltpu.get_tpu_info()
        vmem_capacity = int(getattr(info, "vmem_capacity_bytes", 0) or 0)
    except Exception:
        pass
    if vmem_capacity <= 0:
        vmem_capacity = (64 << 20) if "v7" in kind else (128 << 20)
    two_cores = ("v7" in kind) or (vmem_capacity <= (64 << 20))

    vmem_limit = (vmem_capacity * 3) // 4          # ~96 MiB v5e/v6e, ~48 MiB v7x
    # Single-pass blocks are double-buffered for both input and output (4 copies);
    # keep ~11% headroom:  ~21.3 MiB v5e/v6e, ~10.7 MiB v7x.
    max_single_block = (vmem_limit * 2) // 9
    block_target = min(8 << 20, max_single_block)
    # Reduce pass only double-buffers its input, so its tile can be ~3x larger.
    reduce_block_target = min(3 * block_target, (vmem_limit * 2) // 5)
    return dict(vmem_limit=vmem_limit,
                max_single_block=max_single_block,
                block_target=block_target,
                reduce_block_target=reduce_block_target,
                two_cores=two_cores)


# ---------------------------------------------------------------------------
# Shared channel-conv + sigmoid (operates on a tiny (rows, C) slab)
# ---------------------------------------------------------------------------

def _channel_conv_sigmoid(w_ref, y, channels, k_size):
    """Zero-padded 1D cross-correlation along the channel (lane) axis + sigmoid.

    y: (rows, C) float32, channels lane-major.  w_ref: (k,) float32 in SMEM.
    Matches nn.Conv1d(1, 1, k, padding=(k-1)//2, bias=False).
    """
    pad = (k_size - 1) // 2
    col = jax.lax.broadcasted_iota(jnp.int32, y.shape, 1)   # channel index, built once
    taps = [w_ref[j] for j in range(k_size)]                # hoisted scalar reads
    # Hardware lane rotation when the lane dim is 128-aligned; otherwise the proven
    # jnp.roll lowering on this tiny slab (negligible next to the HBM streaming).
    use_hw_roll = (channels % 128) == 0
    acc = jnp.zeros_like(y)
    for j in range(k_size):                                 # k is tiny & static
        shift = j - pad                                     # source-channel offset
        if shift == 0:
            acc = acc + taps[j] * y
            continue
        amt = (-shift) % channels                           # non-negative rotation
        if use_hw_roll:
            shifted = pltpu.roll(y, amt, axis=1)            # single XLU rotation
        else:
            shifted = jnp.roll(y, amt, axis=1)
        valid = (col + shift >= 0) & (col + shift < channels)
        acc = acc + taps[j] * jnp.where(valid, shifted, jnp.float32(0.0))
    return jax.nn.sigmoid(acc)


# ---------------- single-pass kernel (whole (C, HW) slab resident) ----------------

def _eca_single_pass_kernel(w_ref, x_ref, o_ref, *, channels, k_size, inv_hw):
    """x_ref/o_ref: (bb, C, HW); one or more whole batch elements resident."""
    x = x_ref[...]
    # Global average pool: f32-accumulated sum over the spatial (lane) axis.
    y = jnp.sum(x, axis=-1, dtype=jnp.float32) * jnp.float32(inv_hw)   # (bb, C)
    gate = _channel_conv_sigmoid(w_ref, y, channels, k_size)           # (bb, C)
    o_ref[...] = (x * gate.astype(x.dtype)[:, :, None]).astype(o_ref.dtype)


# ---------------- two-pass kernels (HW tiled: reduce/gate, then apply) -------------

def _eca_reduce_kernel(w_ref, x_ref, g_ref, acc_ref, *,
                       channels, k_size, inv_hw, hw, hw_tile):
    """Grid (B, hw-tiles); hw is the (innermost) reduction axis."""
    j = pl.program_id(1)

    @pl.when(j == 0)
    def _():
        acc_ref[...] = jnp.zeros_like(acc_ref)

    x = x_ref[...]                                           # (1, C, hw_tile)
    if hw % hw_tile != 0:
        # Mask the ragged last tile: out-of-bounds lanes hold stale VMEM data.
        lane = jax.lax.broadcasted_iota(jnp.int32, x.shape, 2) + j * hw_tile
        x = jnp.where(lane < hw, x, jnp.zeros_like(x))
    acc_ref[...] += jnp.sum(x, axis=-1, dtype=jnp.float32)   # (1, C)

    @pl.when(j == pl.num_programs(1) - 1)
    def _():
        y = acc_ref[...] * jnp.float32(inv_hw)
        gate = _channel_conv_sigmoid(w_ref, y, channels, k_size)   # (1, C)
        g_ref[...] = gate[:, :, None].astype(g_ref.dtype)          # (1, C, 1)


def _eca_apply_kernel(g_ref, x_ref, o_ref):
    x = x_ref[...]
    o_ref[...] = (x * g_ref[...].astype(x.dtype)).astype(o_ref.dtype)


# ---------------------------------------------------------------------------
# Wrapper
# ---------------------------------------------------------------------------

def eca_attn(x, conv_weight, *, block_target_bytes=None,
             max_single_block_bytes=None, reduce_block_bytes=None):
    """ECA attention forward. x: (B, C, H, W); conv_weight: (1, 1, k) as in nn.Conv1d."""
    b, c, h, w = x.shape
    hw = h * w
    k = conv_weight.shape[-1]
    assert k % 2 == 1, "ECA uses odd kernel sizes (padding=(k-1)//2 keeps length)"

    cfg = _tpu_config()
    if block_target_bytes is None:
        block_target_bytes = cfg["block_target"]
    if max_single_block_bytes is None:
        max_single_block_bytes = cfg["max_single_block"]
    if reduce_block_bytes is None:
        reduce_block_bytes = cfg["reduce_block_target"]

    itemsize = jnp.dtype(x.dtype).itemsize
    inv_hw = 1.0 / float(hw)

    w_flat = conv_weight.reshape(k).astype(jnp.float32)
    x_flat = x.reshape(b, c, hw)                 # free reshape (trailing-dim merge)
    per_batch_bytes = c * hw * itemsize
    cparams = dict(vmem_limit_bytes=cfg["vmem_limit"])

    if per_batch_bytes <= max_single_block_bytes:
        # ---- single pass: whole (C, HW) slab(s) per step; 2x HBM traffic total ----
        bb_limit = max(1, min(b, block_target_bytes // max(1, per_batch_bytes)))
        if cfg["two_cores"] and b >= 2:
            # Keep >= ~8 grid steps (>= 4 per TensorCore) so DMA-in / compute /
            # DMA-out pipeline stages overlap instead of serialising.
            bb_limit = min(bb_limit, max(1, b // min(8, b)))
        bb = _largest_divisor_leq(b, bb_limit)   # exact divisor: no batch padding
        # TODO(synk): for B == 1 on two-core chips, a C-split with a (k-1)//2 halo
        # would let both TensorCores participate; skipped (mem-bound, low value).

        out = pl.pallas_call(
            functools.partial(_eca_single_pass_kernel,
                              channels=c, k_size=k, inv_hw=inv_hw),
            out_shape=jax.ShapeDtypeStruct((b, c, hw), x.dtype),
            grid_spec=pltpu.PrefetchScalarGridSpec(
                num_scalar_prefetch=0,
                grid=(b // bb,),
                in_specs=[
                    pl.BlockSpec(memory_space=pltpu.MemorySpace.SMEM),   # (k,) weight
                    pl.BlockSpec((bb, c, hw), lambda i: (i, 0, 0)),
                ],
                out_specs=pl.BlockSpec((bb, c, hw), lambda i: (i, 0, 0)),
            ),
            compiler_params=pltpu.CompilerParams(
                dimension_semantics=("parallel",), **cparams),
        )(w_flat, x_flat)
    else:
        # ---- two passes (very large feature maps): HW-tiled reduce -> gate, apply ----
        def pick_hw_tile(byte_budget):
            t = (byte_budget // max(1, c * itemsize)) // 128 * 128
            t = max(128, t)
            return hw if t >= hw else t          # full extent, or a 128-multiple tile

        hw_tile_r = pick_hw_tile(reduce_block_bytes)   # reduce: input buffering only
        hw_tile_a = pick_hw_tile(block_target_bytes)   # apply: input + output buffering
        n_hw_r = pl.cdiv(hw, hw_tile_r)
        n_hw_a = pl.cdiv(hw, hw_tile_a)

        gate = pl.pallas_call(
            functools.partial(_eca_reduce_kernel, channels=c, k_size=k,
                              inv_hw=inv_hw, hw=hw, hw_tile=hw_tile_r),
            out_shape=jax.ShapeDtypeStruct((b, c, 1), jnp.float32),
            grid_spec=pltpu.PrefetchScalarGridSpec(
                num_scalar_prefetch=0,
                grid=(b, n_hw_r),
                in_specs=[
                    pl.BlockSpec(memory_space=pltpu.MemorySpace.SMEM),
                    pl.BlockSpec((1, c, hw_tile_r), lambda i, j: (i, 0, j)),
                ],
                out_specs=pl.BlockSpec((1, c, 1), lambda i, j: (i, 0, 0)),
                scratch_shapes=[pltpu.VMEM((1, c), jnp.float32)],
            ),
            compiler_params=pltpu.CompilerParams(
                dimension_semantics=("parallel", "arbitrary"), **cparams),
        )(w_flat, x_flat)

        out = pl.pallas_call(
            _eca_apply_kernel,
            out_shape=jax.ShapeDtypeStruct((b, c, hw), x.dtype),
            grid_spec=pltpu.PrefetchScalarGridSpec(
                num_scalar_prefetch=0,
                grid=(b, n_hw_a),
                in_specs=[
                    pl.BlockSpec((1, c, 1), lambda i, j: (i, 0, 0)),
                    pl.BlockSpec((1, c, hw_tile_a), lambda i, j: (i, 0, j)),
                ],
                out_specs=pl.BlockSpec((1, c, hw_tile_a), lambda i, j: (i, 0, j)),
            ),
            compiler_params=pltpu.CompilerParams(
                dimension_semantics=("parallel", "parallel"), **cparams),
        )(gate, x_flat)

    return out.reshape(b, c, h, w)


def eca_ref(x, conv_weight):
    """Pure-JAX reference mirroring the PyTorch forward."""
    b, c, h, w = x.shape
    k = conv_weight.shape[-1]
    pad = (k - 1) // 2
    wk = conv_weight.reshape(k)
    y = jnp.mean(x, axis=(2, 3))                                   # (B, C)
    yp = jnp.pad(y, ((0, 0), (pad, pad)))
    conv = sum(wk[j] * yp[:, j:j + c] for j in range(k))           # (B, C)
    gate = jax.nn.sigmoid(conv)[:, :, None, None]
    return x * gate


if __name__ == "__main__":
    key = jax.random.PRNGKey(0)
    kx, kw, kx2 = jax.random.split(key, 3)

    channels, k_size = 8, 3
    # nn.Conv1d(1, 1, k, bias=False) weight shape: (1, 1, k); deterministic init.
    bound = 1.0 / (k_size ** 0.5)
    conv_weight = jax.random.uniform(
        kw, (1, 1, k_size), minval=-bound, maxval=bound, dtype=jnp.float32)

    # --- single-pass path (typical ECA shapes) ---
    B, H, W = 2, 16, 16
    x = jax.random.normal(kx, (B, channels, H, W), dtype=jnp.float32)
    out = jax.block_until_ready(eca_attn(x, conv_weight))
    ref = eca_ref(x, conv_weight)
    assert out.shape == x.shape and out.dtype == x.dtype
    assert jnp.allclose(out, ref, atol=1e-5, rtol=1e-5), "single-pass mismatch vs reference"

    # --- two-pass (reduce/apply) path, forced with tiny thresholds so the HW-tiled
    #     fallback (including the ragged-tile masking) is also exercised ---
    B2, H2, W2 = 2, 20, 20                       # HW = 400: not a multiple of 128
    x2 = jax.random.normal(kx2, (B2, channels, H2, W2), dtype=jnp.float32)
    out2 = jax.block_until_ready(
        eca_attn(x2, conv_weight,
                 block_target_bytes=channels * 128 * 4,     # apply tile = 128
                 reduce_block_bytes=channels * 256 * 4,     # reduce tile = 256
                 max_single_block_bytes=0))
    ref2 = eca_ref(x2, conv_weight)
    assert out2.shape == x2.shape and out2.dtype == x2.dtype
    assert jnp.allclose(out2, ref2, atol=1e-5, rtol=1e-5), "two-pass mismatch vs reference"

    print("KERNEL_OK")
</pallas_src>

<mosaic_0001>
module attributes {stable_mosaic.version = 11 : i64} {
  func.func @_eca_single_pass_kernel(%arg0: i32, %arg1: memref<3xf32, #tpu.memory_space<smem>>, %arg2: memref<2x8x256xf32, #tpu.memory_space<vmem>>, %arg3: memref<2x8x256xf32, #tpu.memory_space<vmem>>) attributes {dimension_semantics = [#tpu.dimension_semantics<parallel>], iteration_bounds = array<i64: 1>, scalar_prefetch = 0 : i64, scratch_operands = 0 : i64, tpu.core_type = #tpu.core_type<tc>, window_params = [{transform_indices = @transform_0, window_bounds = array<i64: 3>}, {transform_indices = @transform_1, window_bounds = array<i64: 2, 8, 256>}, {transform_indices = @transform_2, window_bounds = array<i64: 2, 8, 256>}]} {
    %c0 = arith.constant 0 : index
    %c0_0 = arith.constant 0 : index
    %c0_1 = arith.constant 0 : index
    %0 = vector.load %arg2[%c0, %c0_0, %c0_1] : memref<2x8x256xf32, #tpu.memory_space<vmem>>, vector<2x8x256xf32>
    %cst = arith.constant dense<0.000000e+00> : vector<2x8xf32>
    %1 = vector.multi_reduction <add>, %0, %cst [2] : vector<2x8x256xf32> to vector<2x8xf32>
    %cst_2 = arith.constant 3.906250e-03 : f32
    %2 = vector.broadcast %cst_2 : f32 to vector<2x8xf32>
    %3 = arith.mulf %1, %2 : vector<2x8xf32>
    %4 = tpu.iota {dimensions = array<i32: 1>} : vector<2x8xi32>
    %c0_3 = arith.constant 0 : index
    %5 = memref.load %arg1[%c0_3] : memref<3xf32, #tpu.memory_space<smem>>
    %c1 = arith.constant 1 : index
    %6 = memref.load %arg1[%c1] : memref<3xf32, #tpu.memory_space<smem>>
    %c2 = arith.constant 2 : index
    %7 = memref.load %arg1[%c2] : memref<3xf32, #tpu.memory_space<smem>>
    %cst_4 = arith.constant 0.000000e+00 : f32
    %8 = vector.broadcast %cst_4 : f32 to vector<2x8xf32>
    %9 = vector.extract_strided_slice %3 {offsets = [0, 7], sizes = [2, 1], strides = [1, 1]} : vector<2x8xf32> to vector<2x1xf32>
    %10 = vector.extract_strided_slice %3 {offsets = [0, 0], sizes = [2, 7], strides = [1, 1]} : vector<2x8xf32> to vector<2x7xf32>
    %11 = tpu.concatenate %9, %10 in 1 : vector<2x1xf32>, vector<2x7xf32> -> vector<2x8xf32>
    %c-1_i32 = arith.constant -1 : i32
    %12 = vector.broadcast %c-1_i32 : i32 to vector<2x8xi32>
    %13 = arith.addi %4, %12 : vector<2x8xi32>
    %c0_i32 = arith.constant 0 : i32
    %14 = vector.broadcast %c0_i32 : i32 to vector<2x8xi32>
    %15 = arith.cmpi sge, %13, %14 : vector<2x8xi32>
    %c-1_i32_5 = arith.constant -1 : i32
    %16 = vector.broadcast %c-1_i32_5 : i32 to vector<2x8xi32>
    %17 = arith.addi %4, %16 : vector<2x8xi32>
    %c8_i32 = arith.constant 8 : i32
    %18 = vector.broadcast %c8_i32 : i32 to vector<2x8xi32>
    %19 = arith.cmpi slt, %17, %18 : vector<2x8xi32>
    %20 = arith.andi %15, %19 : vector<2x8xi1>
    %cst_6 = arith.constant 0.000000e+00 : f32
    %21 = vector.broadcast %cst_6 : f32 to vector<2x8xf32>
    %22 = arith.select %20, %11, %21 : vector<2x8xi1>, vector<2x8xf32>
    %23 = vector.broadcast %5 : f32 to vector<2x8xf32>
    %24 = arith.mulf %23, %22 : vector<2x8xf32>
    %25 = arith.addf %8, %24 : vector<2x8xf32>
    %26 = vector.broadcast %6 : f32 to vector<2x8xf32>
    %27 = arith.mulf %26, %3 : vector<2x8xf32>
    %28 = arith.addf %25, %27 : vector<2x8xf32>
    %29 = vector.extract_strided_slice %3 {offsets = [0, 1], sizes = [2, 7], strides = [1, 1]} : vector<2x8xf32> to vector<2x7xf32>
    %30 = vector.extract_strided_slice %3 {offsets = [0, 0], sizes = [2, 1], strides = [1, 1]} : vector<2x8xf32> to vector<2x1xf32>
    %31 = tpu.concatenate %29, %30 in 1 : vector<2x7xf32>, vector<2x1xf32> -> vector<2x8xf32>
    %c1_i32 = arith.constant 1 : i32
    %32 = vector.broadcast %c1_i32 : i32 to vector<2x8xi32>
    %33 = arith.addi %4, %32 : vector<2x8xi32>
    %c0_i32_7 = arith.constant 0 : i32
    %34 = vector.broadcast %c0_i32_7 : i32 to vector<2x8xi32>
    %35 = arith.cmpi sge, %33, %34 : vector<2x8xi32>
    %c1_i32_8 = arith.constant 1 : i32
    %36 = vector.broadcast %c1_i32_8 : i32 to vector<2x8xi32>
    %37 = arith.addi %4, %36 : vector<2x8xi32>
    %c8_i32_9 = arith.constant 8 : i32
    %38 = vector.broadcast %c8_i32_9 : i32 to vector<2x8xi32>
    %39 = arith.cmpi slt, %37, %38 : vector<2x8xi32>
    %40 = arith.andi %35, %39 : vector<2x8xi1>
    %cst_10 = arith.constant 0.000000e+00 : f32
    %41 = vector.broadcast %cst_10 : f32 to vector<2x8xf32>
    %42 = arith.select %40, %31, %41 : vector<2x8xi1>, vector<2x8xf32>
    %43 = vector.broadcast %7 : f32 to vector<2x8xf32>
    %44 = arith.mulf %43, %42 : vector<2x8xf32>
    %45 = arith.addf %28, %44 : vector<2x8xf32>
    %46 = arith.negf %45 : vector<2x8xf32>
    %47 = math.exp %46 : vector<2x8xf32>
    %cst_11 = arith.constant 1.000000e+00 : f32
    %48 = vector.broadcast %cst_11 : f32 to vector<2x8xf32>
    %49 = arith.addf %48, %47 : vector<2x8xf32>
    %50 = arith.divf %48, %49 : vector<2x8xf32>
    %51 = vector.shape_cast %50 : vector<2x8xf32> to vector<2x8x1xf32>
    %52 = vector.broadcast %51 : vector<2x8x1xf32> to vector<2x8x256xf32>
    %53 = arith.mulf %0, %52 : vector<2x8x256xf32>
    %c0_12 = arith.constant 0 : index
    %c0_13 = arith.constant 0 : index
    %c0_14 = arith.constant 0 : index
    %54 = vector.load %arg3[%c0_12, %c0_13, %c0_14] : memref<2x8x256xf32, #tpu.memory_space<vmem>>, vector<2x8x256xf32>
    tpu.vector_store %arg3[%c0_12, %c0_13, %c0_14], %53 {strides = array<i32>} : memref<2x8x256xf32, #tpu.memory_space<vmem>>, vector<2x8x256xf32>,
    return
  }
  func.func @transform_0(%arg0: i32) -> i32 {
    %c0_i32 = arith.constant 0 : i32
    %c0_i32_0 = arith.constant 0 : i32
    return %c0_i32 : i32
  }
  func.func @transform_1(%arg0: i32) -> (i32, i32, i32) {
    %c0_i32 = arith.constant 0 : i32
    %c0_i32_0 = arith.constant 0 : i32
    %c0_i32_1 = arith.constant 0 : i32
    return %arg0, %c0_i32, %c0_i32_0 : i32, i32, i32
  }
  func.func @transform_2(%arg0: i32) -> (i32, i32, i32) {
    %c0_i32 = arith.constant 0 : i32
    %c0_i32_0 = arith.constant 0 : i32
    %c0_i32_1 = arith.constant 0 : i32
    return %arg0, %c0_i32, %c0_i32_0 : i32, i32, i32
  }
}

</mosaic_0001>

<bundles_post_ra>
// kernel: tpu_custom_call.1
= control target key start
LH: loop header
LB: loop body
LE: loop exit
PB: predicated region body
PF: predicated region fallthrough
CT: control target
= control target key end

     0   :  { %7 = vsyncpa [#allocation5], 0  ;;  %s329_s0 = inlined_call_operand.hbm [shape: f32[3], index: 0, kind: input, shape index: {}]   ;;  %s330_s1 = inlined_call_operand.hbm [shape: f32[2,8,256], index: 1, kind: input, shape index: {}]   ;;  %s331_s2 = inlined_call_operand.hbm [shape: f32[2,8,256], index: 2, kind: output, shape index: {}]  }
   0x1   :  { %8 = vsyncpa [#allocation3], 0 }
   0x2   :  { %9 = vsyncpa [#allocation4], 0  ;;  %s252_s9 = smov [#allocation2]   ;;  %s253_s12 = smov [#allocation6]  }
   0x3   :  { %17 = dma.hbm_to_smem %s329_s0, 16, %s252_s9, [#allocation5]  }
   0x4   :  { %s23_s13 = sshll.u32 %s253_s12, 4  ;;  %s24_s13 = int_to_ptr.vmem [resolvable:$true] %s23_s13 }
   0x5   :  { %s214_s14 = scalar_lea.vmem %s24_s13, 512  ;;  %p219_p1 = scmp.lt.s32.totalorder %s24_s13, %s24_s13 }
   0x6   :  { %p215_p0 = scmp.ne.s32.totalorder %s24_s13, %s214_s14  ;;  %p220_p2 = scmp.lt.s32.totalorder %s214_s14, %s214_s14 }
   0x8   :  { %p221_p3 = por %p220_p2, %p219_p1 }
   0xa   :  { %p222_p4 = pnand %p221_p3, %p215_p0 }
   0xc   :  { %225 = shalt.err (!%p222_p4)
}
   0xd   :  { %s254_s15 = smov 256   ;;  %s255_s16 = smov 16  }
   0xe   :  { %29 = dma.hbm_to_vmem [thread:$0]  %s330_s1, 512, %s24_s13, [#allocation3], %s254_s15, %s254_s15, %s255_s16  }
   0xf   :  { %246 = dma.done.wait [#allocation5], 16  }
  0x10   :  { %247 = vsyncadd [#allocation5], 4294967280 }
  0x11   :  { %248 = dma.done.wait [#allocation3], 512  }
  0x12   :  { %249 = vsyncadd [#allocation3], 4294966784 }
  0x13   :  { %36 = sfence }
  0x14   :  { %v281_v0 = vld [vmem:[#allocation6] sm:$0xff]  ;;  %v283_v1 = vld [vmem:[#allocation6 + $0x8] sm:$0xff]  ;;  %v285_v2 = vld [vmem:[#allocation6 + $0x10] sm:$0xff]  ;;  %v49_v6 = vlaneseq  ;;  %s295_s0 = sld [smem:[#allocation2]]  ;;  %vm70_vm0 = vcmask 7168   ;;  %vm109_vm4 = vcmask 1042434  }
  0x15   :  { %v41_v3 = vadd.f32 %v283_v1, %v281_v0  ;;  %v289_v4 = vld [vmem:[#allocation6 + $0x18] sm:$0xff]  ;;  %s181_s1 = sld [smem:[#allocation2 + $0x1]]  ;;  %vm116_vm5 = vcmask 56320   ;;  %s256_s20 = smov [#allocation7]  }
  0x16   :  { %v44_v5 = vadd.f32 %v289_v4, %v285_v2  ;;  %v50_v7 = vand.u32 127, %v49_v6  ;;  %v293_v9 = vshrl.u32 %v49_v6, 7  ;;  %s298_s19 = sld [smem:[#allocation2 + $0x2]]  ;;  %s168_s21 = sshll.u32 %s256_s20, 4  ;;  %s169_s21 = int_to_ptr.vmem [resolvable:$true] %s168_s21 }
  0x17   :  { %42 = vadd.xlane.f32.xlu0 %v41_v3  ;;  %s226_s22 = scalar_lea.vmem %s169_s21, 512  ;;  %p231_p6 = scmp.lt.s32.totalorder %s169_s21, %s169_s21 }
  0x18   :  { %v59_v8 = vadd.s32 4294967295, %v50_v7  ;;  %v100_v11 = vadd.s32 1, %v50_v7  ;;  %v90_v30 = vsub.s32 %v50_v7, %v293_v9  ;;  %v143_v55 = vsub.s32 7, %v293_v9  ;;  %p227_p5 = scmp.ne.s32.totalorder %s169_s21, %s226_s22  ;;  %p232_p7 = scmp.lt.s32.totalorder %s226_s22, %s226_s22 }
  0x19   :  { %v150_v58 = vsub.s32 0, %v293_v9 }
  0x1a   :  { %v62_v10 = vsub.s32 %v59_v8, %v293_v9  ;;  %vm73_vm1 = vcmp.ge.s32.totalorder %v59_v8, 0  ;;  %vm74_vm2 = vcmp.lt.s32.totalorder %v59_v8, 8  ;;  %v103_v14 = vsub.s32 %v100_v11, %v293_v9  ;;  %p233_p8 = por %p232_p7, %p231_p6 }
  0x1b   :  { %45 = vadd.xlane.f32.xlu0 %v44_v5  ;;  %vm301_vm3 = vmand %vm73_vm1, %vm74_vm2  ;;  %v78_v20 = vstv %s295_s0  ;;  %v83_v21 = vstv %s181_s1  ;;  %vm119_vm6 = vcmp.lt.s32.totalorder %v100_v11, 8 }
  0x1c   :  { %v122_v33 = vstv %s298_s19  ;;  %p234_p9 = pnand %p233_p8, %p227_p5 }
  0xa0   :  { %v43_v12 = vpop.xlane.xlu0 %42 }
  0xa1   :  { %v47_v13 = vmul.f32 0.00390625, %v43_v12 }
  0xa3   :  { %v63_v15 = vrot.slane %v47_v13, %v62_v10  ;;  %v104_v22 = vrot.slane %v47_v13, %v103_v14  ;;  %v112_v27 = vrot.slane %v47_v13, 7  ;;  %v84_v31 = vmul.f32 %v83_v21, %v47_v13 }
  0xa4   :  { %v46_v16 = vpop.xlane.xlu0 %45 }
  0xa5   :  { %v71_v18 = vsel %vm70_vm0, %v47_v13, %v63_v15  ;;  %v48_v19 = vmul.f32 0.00390625, %v46_v16  ;;  %v91_v42 = vrot.slane %v84_v31, %v90_v30 }
  0xa6   :  { %v76_v26 = vsel %vm301_vm3, %v71_v18, 0.0 }
  0xa7   :  { %v56_v23 = vrot.slane %v48_v19, 7  ;;  %v67_v24 = vrot.slane %v48_v19, %v62_v10  ;;  %v85_v25 = vmul.f32 %v83_v21, %v48_v19  ;;  %v108_v28 = vrot.slane %v48_v19, %v103_v14 }
  0xa8   :  { %v113_v29 = vrot.slane %v48_v19, 6  ;;  %v79_v37 = vmul.f32 %v78_v20, %v76_v26 }
  0xa9   :  { %v72_v32 = vsel %vm70_vm0, %v56_v23, %v67_v24  ;;  %v110_v35 = vsel %vm109_vm4, %v108_v28, %v104_v22  ;;  %v95_v39 = vrot.slane %v85_v25, %v90_v30 }
  0xaa   :  { %v77_v34 = vsel %vm301_vm3, %v72_v32, 0.0  ;;  %v114_v36 = vsel %vm109_vm4, %v113_v29, %v112_v27  ;;  %v98_v45 = vadd.f32 %v91_v42, %v79_v37 }
  0xab   :  { %v80_v38 = vmul.f32 %v78_v20, %v77_v34  ;;  %v117_v40 = vsel %vm116_vm5, %v110_v35, %v114_v36 }
  0xac   :  { %v121_v41 = vsel %vm119_vm6, %v117_v40, 0.0 }
  0xad   :  { %v99_v43 = vadd.f32 %v95_v39, %v80_v38  ;;  %v123_v44 = vmul.f32 %v122_v33, %v121_v41 }
  0xaf   :  { %v125_v46 = vrot.slane %v123_v44, 2 }
  0xb1   :  { %v128_v47 = vadd.f32 %v125_v46, %v99_v43  ;;  %v127_v48 = vadd.f32 %v125_v46, %v98_v45 }
  0xb3   :  { %v184_v49 = vmul.f32 -1.442695, %v128_v47  ;;  %v183_v50 = vmul.f32 -1.442695, %v127_v48 }
  0xb5   :  { %190 = vpow2.f32 %v184_v49 }
  0xb6   :  { %192 = vpow2.f32 %v183_v50 }
  0xc2   :  { %v191_v51 = vpop.eup %190 }
  0xc3   :  { %v193_v52 = vpop.eup %192  ;;  %v136_v54 = vadd.f32 1.0, %v191_v51 }
  0xc4   :  { %v135_v53 = vadd.f32 1.0, %v193_v52 }
  0xc6   :  { %194 = vrcp.f32 %v135_v53 }
  0xc7   :  { %196 = vrcp.f32 %v136_v54 }
  0xd3   :  { %v195_v56 = vpop.eup %194 }
  0xd4   :  { %v144_v57 = vrot.slane %v195_v56, %v143_v55  ;;  %v197_v59 = vpop.eup %196 }
  0xd5   :  { %v151_v60 = vrot.slane %v197_v59, %v150_v58 }
  0xd6   :  { %146 = vbcast.lane.b32.xlu1 %v144_v57, 256 }
  0xda   :  { %153 = vbcast.lane.b32.xlu1 %v151_v60, 256 }
 0x148   :  { %v147_v61 = vpop.permute.xlu1 %146 }
 0x149   :  { %v155_v62 = vmul.f32 %v147_v61, %v281_v0  ;;  %v156_v63 = vmul.f32 %v147_v61, %v283_v1 }
 0x14b   :  { %159 = vst [vmem:[#allocation7] sm:$0xff] %v155_v62  ;;  %160 = vst [vmem:[#allocation7 + $0x8] sm:$0xff] %v156_v63 }
 0x14c   :  { %v154_v3 = vpop.permute.xlu1 %153 }
 0x14d   :  { %v157_v5 = vmul.f32 %v154_v3, %v285_v2  ;;  %v158_v6 = vmul.f32 %v154_v3, %v289_v4 }
 0x14f   :  { %161 = vst [vmem:[#allocation7 + $0x10] sm:$0xff] %v157_v5  ;;  %162 = vst [vmem:[#allocation7 + $0x18] sm:$0xff] %v158_v6 }
 0x150   :  { %237 = shalt.err (!%p234_p9)
}
 0x151   :  { %174 = dma.vmem_to_hbm [thread:$0]  %s169_s21, 512, %s331_s2, [#allocation4], %s254_s15, %s254_s15, %s255_s16  }
 0x152   :  { %250 = dma.done.wait [#allocation4], 512  }
 0x153   :  { %251 = vsyncadd [#allocation4], 4294966784 }
 0x154   :  { %178 = vsyncpa [#allocation3], 1 }
 0x155   :  { %179 = vsyncpa [#allocation4], 1 }
 0x156   :  { %180 = vsyncpa [#allocation5], 1 }

</bundles_post_ra>
